<compile_context>
chip_gen: v5e
topology: v5e:2x2
jax: 0.10.0
libtpu: 0.0.40
codegen_flags: <defaults>
</compile_context>

<pallas_src>
import functools
import math

import jax
import jax.numpy as jnp
from jax.experimental import pallas as pl
from jax.experimental.pallas import tpu as pltpu

_VMEM_LIMIT = 32 * 1024 * 1024  # explicit scoped-VMEM limit, safe on v5e/v6e/v7x


def _cparams(dimension_semantics):
    return pltpu.CompilerParams(dimension_semantics=dimension_semantics,
                                vmem_limit_bytes=_VMEM_LIMIT)


def _layernorm_f32(x, gamma, beta, eps):
    mean = jnp.mean(x, axis=-1, keepdims=True)
    cen = x - mean
    var = jnp.mean(cen * cen, axis=-1, keepdims=True)   # biased, like PyTorch LN
    return cen * jax.lax.rsqrt(var + eps) * gamma + beta


def _row_tile(m, cap=256):
    """Row-tile size: whole M when small, else a multiple-of-8 divisor <= cap."""
    if m <= cap:
        return m
    t = cap
    while t >= 8 and m % t:
        t -= 8
    return t if (t >= 8 and m % t == 0) else m


# ------------------- kernel 1: QKV + attention + out-proj + add + LN1 --------


def _attn_layer_kernel(q_ref, kv_ref, wq_ref, bq_ref, wkv_ref, bkv_ref,
                       wo_ref, bo_ref, g1_ref, be1_ref, o_ref,
                       *, num_heads, scale, eps):
    q_in = q_ref[0].astype(jnp.float32)       # (Lq, E)  raw layer input (residual)
    kv_in = kv_ref[0].astype(jnp.float32)     # (Lk, E)
    wq = wq_ref[...].astype(jnp.float32)      # (E, E)   (in, out)
    wkv = wkv_ref[...].astype(jnp.float32)    # (E, 2E)  (in, out) = [Wk | Wv]
    wo = wo_ref[...].astype(jnp.float32)      # (E, E)   (in, out)

    Lq, E = q_in.shape
    Dh = E // num_heads

    # Fused projections: one matmul for Q, one for K+V (lane-dense outputs).
    qp = jnp.dot(q_in, wq, preferred_element_type=jnp.float32) \
        + bq_ref[...].astype(jnp.float32)                                  # (Lq, E)
    kvp = jnp.dot(kv_in, wkv, preferred_element_type=jnp.float32) \
        + bkv_ref[...].astype(jnp.float32)                                 # (Lk, 2E)

    # Multi-head attention with the out-projection folded into the per-head
    # accumulate:  ctx @ Wo == sum_h ctx_h @ Wo[h*Dh:(h+1)*Dh, :].  The
    # accumulator stays lane-dense at width E (no lane concatenation).
    # TODO(synk): for long Lk, tile Lk with an online-softmax accumulator.
    acc = jnp.zeros((Lq, E), jnp.float32)
    for h in range(num_heads):
        lo = h * Dh
        qh = qp[:, lo:lo + Dh]                 # (Lq, Dh)
        kh = kvp[:, lo:lo + Dh]                # (Lk, Dh)
        vh = kvp[:, E + lo:E + lo + Dh]        # (Lk, Dh)
        s = jax.lax.dot_general(
            qh, kh, dimension_numbers=(((1,), (1,)), ((), ())),
            preferred_element_type=jnp.float32) * scale                    # (Lq, Lk)
        s = s - jnp.max(s, axis=-1, keepdims=True)
        p = jnp.exp(s)
        p = p * pl.reciprocal(jnp.sum(p, axis=-1, keepdims=True), approx=True)
        ctx_h = jnp.dot(p, vh, preferred_element_type=jnp.float32)         # (Lq, Dh)
        acc = acc + jnp.dot(ctx_h, wo[lo:lo + Dh, :],
                            preferred_element_type=jnp.float32)            # (Lq, E)

    attn = acc + bo_ref[...].astype(jnp.float32)

    y = _layernorm_f32(q_in + attn,
                       g1_ref[...].astype(jnp.float32),
                       be1_ref[...].astype(jnp.float32), eps)
    o_ref[0] = y.astype(o_ref.dtype)


def attn_block(query_bf, key_value_bf, wq, bq, wkv, bkv, wo, bo,
               gamma1, beta1, num_heads, eps=1e-5):
    """Fused (QKV proj + MHA + out proj + residual + LN1), grid over batch."""
    B, Lq, E = query_bf.shape
    Lk = key_value_bf.shape[1]
    Dh = E // num_heads
    kern = functools.partial(_attn_layer_kernel, num_heads=num_heads,
                             scale=1.0 / math.sqrt(Dh), eps=eps)
    full = lambda b: (0, 0)
    return pl.pallas_call(
        kern,
        out_shape=jax.ShapeDtypeStruct((B, Lq, E), query_bf.dtype),
        grid=(B,),
        in_specs=[
            pl.BlockSpec((1, Lq, E), lambda b: (b, 0, 0)),
            pl.BlockSpec((1, Lk, E), lambda b: (b, 0, 0)),
            pl.BlockSpec((E, E), full),
            pl.BlockSpec((1, E), full),
            pl.BlockSpec((E, 2 * E), full),
            pl.BlockSpec((1, 2 * E), full),
            pl.BlockSpec((E, E), full),
            pl.BlockSpec((1, E), full),
            pl.BlockSpec((1, E), full),
            pl.BlockSpec((1, E), full),
        ],
        out_specs=pl.BlockSpec((1, Lq, E), lambda b: (b, 0, 0)),
        compiler_params=_cparams(("parallel",)),
    )(query_bf, key_value_bf,
      wq, bq.reshape(1, E), wkv, bkv.reshape(1, 2 * E),
      wo, bo.reshape(1, E), gamma1.reshape(1, E), beta1.reshape(1, E))


# --------------- kernel 2: linear1 + ReLU + linear2 + add + LN2 --------------


def _ffn_ln_kernel(x_ref, w1_ref, b1_ref, w2_ref, b2_ref, g_ref, be_ref, o_ref,
                   *, eps):
    x = x_ref[...].astype(jnp.float32)                                     # (tm, E)
    h = jnp.dot(x, w1_ref[...].astype(jnp.float32),
                preferred_element_type=jnp.float32) + b1_ref[...].astype(jnp.float32)
    h = jnp.maximum(h, 0.0)                                                # ReLU
    f = jnp.dot(h, w2_ref[...].astype(jnp.float32),
                preferred_element_type=jnp.float32) + b2_ref[...].astype(jnp.float32)
    y = _layernorm_f32(x + f,
                       g_ref[...].astype(jnp.float32),
                       be_ref[...].astype(jnp.float32), eps)
    o_ref[...] = y.astype(o_ref.dtype)


def ffn_ln(x, w1, b1, w2, b2, gamma, beta, eps=1e-5):
    """Fused FFN + residual + LN2.  x: (M, E); w1: (E, F); w2: (F, E)."""
    M, E = x.shape
    F = w1.shape[1]
    tm = _row_tile(M)
    kern = functools.partial(_ffn_ln_kernel, eps=eps)
    full = lambda i: (0, 0)
    return pl.pallas_call(
        kern,
        out_shape=jax.ShapeDtypeStruct((M, E), x.dtype),
        grid=(M // tm,),
        in_specs=[
            pl.BlockSpec((tm, E), lambda i: (i, 0)),
            pl.BlockSpec((E, F), full),
            pl.BlockSpec((1, F), full),
            pl.BlockSpec((F, E), full),
            pl.BlockSpec((1, E), full),
            pl.BlockSpec((1, E), full),
            pl.BlockSpec((1, E), full),
        ],
        out_specs=pl.BlockSpec((tm, E), lambda i: (i, 0)),
        compiler_params=_cparams(("parallel",)),
    )(x, w1, b1.reshape(1, F), w2, b2.reshape(1, E),
      gamma.reshape(1, E), beta.reshape(1, E))


# ----------------------------- final plain LayerNorm -------------------------


def _ln_kernel(x_ref, g_ref, b_ref, o_ref, *, eps):
    y = _layernorm_f32(x_ref[...].astype(jnp.float32),
                       g_ref[...].astype(jnp.float32),
                       b_ref[...].astype(jnp.float32), eps)
    o_ref[...] = y.astype(o_ref.dtype)


def layernorm(x, gamma, beta, eps=1e-5):
    M, E = x.shape
    tm = _row_tile(M)
    kern = functools.partial(_ln_kernel, eps=eps)
    return pl.pallas_call(
        kern,
        out_shape=jax.ShapeDtypeStruct((M, E), x.dtype),
        grid=(M // tm,),
        in_specs=[
            pl.BlockSpec((tm, E), lambda i: (i, 0)),
            pl.BlockSpec((1, E), lambda i: (0, 0)),
            pl.BlockSpec((1, E), lambda i: (0, 0)),
        ],
        out_specs=pl.BlockSpec((tm, E), lambda i: (i, 0)),
        compiler_params=_cparams(("parallel",)),
    )(x, gamma.reshape(1, E), beta.reshape(1, E))


# --------------------------- layer / module logic ----------------------------


def encoder_layer_cross_att(query_bf, key_value_bf, p, num_heads):
    """One cross-attention transformer encoder layer (post-norm), batch-first."""
    B, Lq, E = query_bf.shape

    # Pre-transpose weights once (outside the kernels) to (in, out) layout so
    # the MXU contracts directly on the last input dim (no .T in-kernel).
    w_in, b_in = p["in_proj_weight"], p["in_proj_bias"]          # (3E, E), (3E,)
    wq = w_in[:E].T                                              # (E, E)
    wkv = w_in[E:].T                                             # (E, 2E) = [k | v]
    wo = p["out_proj_weight"].T                                  # (E, E)

    # kernel 1: Q/KV projection + MHA + out-proj + residual + LayerNorm1
    x1 = attn_block(query_bf, key_value_bf,
                    wq, b_in[:E], wkv, b_in[E:], wo, p["out_proj_bias"],
                    p["norm1_gamma"], p["norm1_beta"], num_heads)

    # kernel 2: linear1 + ReLU + linear2 + residual + LayerNorm2
    x2 = ffn_ln(x1.reshape(B * Lq, E),
                p["linear1_weight"].T, p["linear1_bias"],
                p["linear2_weight"].T, p["linear2_bias"],
                p["norm2_gamma"], p["norm2_beta"])
    return x2.reshape(B, Lq, E)


def trans_encoder_cross_att(query, key_value, layer_params, norm_params, num_heads):
    """TransEncoderCrossAtt.forward.  query/key_value: (seq, batch, embed)."""
    # Single layout change to batch-first for the whole stack (and back at the
    # end) -- removes the per-layer head split/merge transposes.
    out = jnp.transpose(query, (1, 0, 2))            # (B, Lq, E)
    kv_bf = jnp.transpose(key_value, (1, 0, 2))      # (B, Lk, E)
    for p in layer_params:
        out = encoder_layer_cross_att(out, kv_bf, p, num_heads)
    if norm_params is not None:
        B, Lq, E = out.shape
        out = layernorm(out.reshape(B * Lq, E),
                        norm_params["gamma"], norm_params["beta"]).reshape(B, Lq, E)
    return jnp.transpose(out, (1, 0, 2))             # back to (Lq, B, E)


# ------------------------------ param init -----------------------------------


def init_layer_params(key, embed_dim, ffn_dim):
    ks = jax.random.split(key, 6)
    s = 0.05
    return {
        "in_proj_weight": s * jax.random.normal(ks[0], (3 * embed_dim, embed_dim), jnp.float32),
        "in_proj_bias": s * jax.random.normal(ks[1], (3 * embed_dim,), jnp.float32),
        "out_proj_weight": s * jax.random.normal(ks[2], (embed_dim, embed_dim), jnp.float32),
        "out_proj_bias": jnp.zeros((embed_dim,), jnp.float32),
        "linear1_weight": s * jax.random.normal(ks[3], (ffn_dim, embed_dim), jnp.float32),
        "linear1_bias": s * jax.random.normal(ks[4], (ffn_dim,), jnp.float32),
        "linear2_weight": s * jax.random.normal(ks[5], (embed_dim, ffn_dim), jnp.float32),
        "linear2_bias": jnp.zeros((embed_dim,), jnp.float32),
        "norm1_gamma": jnp.ones((embed_dim,), jnp.float32),
        "norm1_beta": jnp.zeros((embed_dim,), jnp.float32),
        "norm2_gamma": jnp.ones((embed_dim,), jnp.float32),
        "norm2_beta": jnp.zeros((embed_dim,), jnp.float32),
    }


# --------------------------------- main ---------------------------------------


if __name__ == "__main__":
    # Small shapes: seq=8, batch=2, embed=32, heads=4, ffn=64, layers=2
    Lq, Lk, B, E, H, FFN, NUM_LAYERS = 8, 8, 2, 32, 4, 64, 2

    key = jax.random.PRNGKey(0)
    k_q, k_kv, k_p = jax.random.split(key, 3)

    query = jax.random.normal(k_q, (Lq, B, E), jnp.float32)       # (seq, batch, embed)
    key_value = jax.random.normal(k_kv, (Lk, B, E), jnp.float32)  # (seq, batch, embed)

    layer_keys = jax.random.split(k_p, NUM_LAYERS)
    layer_params = [init_layer_params(k, E, FFN) for k in layer_keys]
    norm_params = {"gamma": jnp.ones((E,), jnp.float32),
                   "beta": jnp.zeros((E,), jnp.float32)}

    fwd = jax.jit(
        lambda q, kv, lp, npar: trans_encoder_cross_att(q, kv, lp, npar, H))
    out = jax.block_until_ready(fwd(query, key_value, layer_params, norm_params))

    assert out.shape == (Lq, B, E)
    assert bool(jnp.all(jnp.isfinite(out)))
    print("KERNEL_OK")
</pallas_src>

<mosaic_0001>
module attributes {stable_mosaic.version = 11 : i64} {
  func.func @_ln_kernel(%arg0: i32, %arg1: memref<16x32xf32, #tpu.memory_space<vmem>>, %arg2: memref<1x32xf32, #tpu.memory_space<vmem>>, %arg3: memref<1x32xf32, #tpu.memory_space<vmem>>, %arg4: memref<16x32xf32, #tpu.memory_space<vmem>>) attributes {dimension_semantics = [#tpu.dimension_semantics<parallel>], iteration_bounds = array<i64: 1>, scalar_prefetch = 0 : i64, scratch_operands = 0 : i64, tpu.core_type = #tpu.core_type<tc>, window_params = [{transform_indices = @transform_0, window_bounds = array<i64: 16, 32>}, {pipeline_mode = #tpu.pipeline_mode<synchronous>, transform_indices = @transform_1, window_bounds = array<i64: 1, 32>}, {pipeline_mode = #tpu.pipeline_mode<synchronous>, transform_indices = @transform_2, window_bounds = array<i64: 1, 32>}, {transform_indices = @transform_3, window_bounds = array<i64: 16, 32>}]} {
    %c0 = arith.constant 0 : index
    %c0_0 = arith.constant 0 : index
    %0 = vector.load %arg1[%c0, %c0_0] : memref<16x32xf32, #tpu.memory_space<vmem>>, vector<16x32xf32>
    %c0_1 = arith.constant 0 : index
    %c0_2 = arith.constant 0 : index
    %1 = vector.load %arg2[%c0_1, %c0_2] : memref<1x32xf32, #tpu.memory_space<vmem>>, vector<1x32xf32>
    %c0_3 = arith.constant 0 : index
    %c0_4 = arith.constant 0 : index
    %2 = vector.load %arg3[%c0_3, %c0_4] : memref<1x32xf32, #tpu.memory_space<vmem>>, vector<1x32xf32>
    %cst = arith.constant dense<0.000000e+00> : vector<16xf32>
    %3 = vector.multi_reduction <add>, %0, %cst [1] : vector<16x32xf32> to vector<16xf32>
    %4 = vector.shape_cast %3 : vector<16xf32> to vector<16x1xf32>
    %cst_5 = arith.constant 3.200000e+01 : f32
    %5 = vector.broadcast %cst_5 : f32 to vector<16x1xf32>
    %6 = arith.divf %4, %5 : vector<16x1xf32>
    %7 = vector.broadcast %6 : vector<16x1xf32> to vector<16x32xf32>
    %8 = arith.subf %0, %7 : vector<16x32xf32>
    %9 = arith.mulf %8, %8 : vector<16x32xf32>
    %cst_6 = arith.constant dense<0.000000e+00> : vector<16xf32>
    %10 = vector.multi_reduction <add>, %9, %cst_6 [1] : vector<16x32xf32> to vector<16xf32>
    %11 = vector.shape_cast %10 : vector<16xf32> to vector<16x1xf32>
    %cst_7 = arith.constant 3.200000e+01 : f32
    %12 = vector.broadcast %cst_7 : f32 to vector<16x1xf32>
    %13 = arith.divf %11, %12 : vector<16x1xf32>
    %cst_8 = arith.constant 9.99999974E-6 : f32
    %14 = vector.broadcast %cst_8 : f32 to vector<16x1xf32>
    %15 = arith.addf %13, %14 : vector<16x1xf32>
    %16 = math.rsqrt %15 : vector<16x1xf32>
    %17 = vector.broadcast %16 : vector<16x1xf32> to vector<16x32xf32>
    %18 = arith.mulf %8, %17 : vector<16x32xf32>
    %19 = vector.broadcast %1 : vector<1x32xf32> to vector<16x32xf32>
    %20 = arith.mulf %18, %19 : vector<16x32xf32>
    %21 = vector.broadcast %2 : vector<1x32xf32> to vector<16x32xf32>
    %22 = arith.addf %20, %21 : vector<16x32xf32>
    %c0_9 = arith.constant 0 : index
    %c0_10 = arith.constant 0 : index
    %23 = vector.load %arg4[%c0_9, %c0_10] : memref<16x32xf32, #tpu.memory_space<vmem>>, vector<16x32xf32>
    tpu.vector_store %arg4[%c0_9, %c0_10], %22 {strides = array<i32>} : memref<16x32xf32, #tpu.memory_space<vmem>>, vector<16x32xf32>,
    return
  }
  func.func @transform_0(%arg0: i32) -> (i32, i32) {
    %c0_i32 = arith.constant 0 : i32
    %c0_i32_0 = arith.constant 0 : i32
    return %arg0, %c0_i32 : i32, i32
  }
  func.func @transform_1(%arg0: i32) -> (i32, i32) {
    %c0_i32 = arith.constant 0 : i32
    %c0_i32_0 = arith.constant 0 : i32
    %c0_i32_1 = arith.constant 0 : i32
    return %c0_i32, %c0_i32_0 : i32, i32
  }
  func.func @transform_2(%arg0: i32) -> (i32, i32) {
    %c0_i32 = arith.constant 0 : i32
    %c0_i32_0 = arith.constant 0 : i32
    %c0_i32_1 = arith.constant 0 : i32
    return %c0_i32, %c0_i32_0 : i32, i32
  }
  func.func @transform_3(%arg0: i32) -> (i32, i32) {
    %c0_i32 = arith.constant 0 : i32
    %c0_i32_0 = arith.constant 0 : i32
    return %arg0, %c0_i32 : i32, i32
  }
}

module attributes {stable_mosaic.version = 11 : i64} {
  func.func @_attn_layer_kernel(%arg0: i32, %arg1: memref<1x8x32xf32, #tpu.memory_space<vmem>>, %arg2: memref<1x8x32xf32, #tpu.memory_space<vmem>>, %arg3: memref<32x32xf32, #tpu.memory_space<vmem>>, %arg4: memref<1x32xf32, #tpu.memory_space<vmem>>, %arg5: memref<32x64xf32, #tpu.memory_space<vmem>>, %arg6: memref<1x64xf32, #tpu.memory_space<vmem>>, %arg7: memref<32x32xf32, #tpu.memory_space<vmem>>, %arg8: memref<1x32xf32, #tpu.memory_space<vmem>>, %arg9: memref<1x32xf32, #tpu.memory_space<vmem>>, %arg10: memref<1x32xf32, #tpu.memory_space<vmem>>, %arg11: memref<1x8x32xf32, #tpu.memory_space<vmem>>) attributes {dimension_semantics = [#tpu.dimension_semantics<parallel>], iteration_bounds = array<i64: 2>, scalar_prefetch = 0 : i64, scratch_operands = 0 : i64, tpu.core_type = #tpu.core_type<tc>, window_params = [{transform_indices = @transform_0, window_bounds = array<i64: 1, 8, 32>}, {transform_indices = @transform_1, window_bounds = array<i64: 1, 8, 32>}, {pipeline_mode = #tpu.pipeline_mode<synchronous>, transform_indices = @transform_2, window_bounds = array<i64: 32, 32>}, {pipeline_mode = #tpu.pipeline_mode<synchronous>, transform_indices = @transform_3, window_bounds = array<i64: 1, 32>}, {pipeline_mode = #tpu.pipeline_mode<synchronous>, transform_indices = @transform_4, window_bounds = array<i64: 32, 64>}, {pipeline_mode = #tpu.pipeline_mode<synchronous>, transform_indices = @transform_5, window_bounds = array<i64: 1, 64>}, {pipeline_mode = #tpu.pipeline_mode<synchronous>, transform_indices = @transform_6, window_bounds = array<i64: 32, 32>}, {pipeline_mode = #tpu.pipeline_mode<synchronous>, transform_indices = @transform_7, window_bounds = array<i64: 1, 32>}, {pipeline_mode = #tpu.pipeline_mode<synchronous>, transform_indices = @transform_8, window_bounds = array<i64: 1, 32>}, {pipeline_mode = #tpu.pipeline_mode<synchronous>, transform_indices = @transform_9, window_bounds = array<i64: 1, 32>}, {transform_indices = @transform_10, window_bounds = array<i64: 1, 8, 32>}]} {
    %c0 = arith.constant 0 : index
    %c0_0 = arith.constant 0 : index
    %c0_1 = arith.constant 0 : index
    %0 = vector.load %arg1[%c0, %c0_0, %c0_1] : memref<1x8x32xf32, #tpu.memory_space<vmem>>, vector<1x8x32xf32>
    %1 = vector.shape_cast %0 : vector<1x8x32xf32> to vector<8x32xf32>
    %c0_2 = arith.constant 0 : index
    %c0_3 = arith.constant 0 : index
    %c0_4 = arith.constant 0 : index
    %2 = vector.load %arg2[%c0_2, %c0_3, %c0_4] : memref<1x8x32xf32, #tpu.memory_space<vmem>>, vector<1x8x32xf32>
    %3 = vector.shape_cast %2 : vector<1x8x32xf32> to vector<8x32xf32>
    %c0_5 = arith.constant 0 : index
    %c0_6 = arith.constant 0 : index
    %4 = vector.load %arg3[%c0_5, %c0_6] : memref<32x32xf32, #tpu.memory_space<vmem>>, vector<32x32xf32>
    %c0_7 = arith.constant 0 : index
    %c0_8 = arith.constant 0 : index
    %5 = vector.load %arg5[%c0_7, %c0_8] : memref<32x64xf32, #tpu.memory_space<vmem>>, vector<32x64xf32>
    %c0_9 = arith.constant 0 : index
    %c0_10 = arith.constant 0 : index
    %6 = vector.load %arg7[%c0_9, %c0_10] : memref<32x32xf32, #tpu.memory_space<vmem>>, vector<32x32xf32>
    %cst = arith.constant dense<0.000000e+00> : vector<8x32xf32>
    %7 = tpu.matmul %1, %4, %cst {dimension_numbers = #tpu.dot_dimension_numbers<[1], [0], [0], [1], [0, 0, 1, 1], [], []>} : vector<8x32xf32>, vector<32x32xf32>, vector<8x32xf32> -> vector<8x32xf32>
    %c0_11 = arith.constant 0 : index
    %c0_12 = arith.constant 0 : index
    %8 = vector.load %arg4[%c0_11, %c0_12] : memref<1x32xf32, #tpu.memory_space<vmem>>, vector<1x32xf32>
    %9 = vector.broadcast %8 : vector<1x32xf32> to vector<8x32xf32>
    %10 = arith.addf %7, %9 : vector<8x32xf32>
    %cst_13 = arith.constant dense<0.000000e+00> : vector<8x64xf32>
    %11 = tpu.matmul %3, %5, %cst_13 {dimension_numbers = #tpu.dot_dimension_numbers<[1], [0], [0], [1], [0, 0, 1, 1], [], []>} : vector<8x32xf32>, vector<32x64xf32>, vector<8x64xf32> -> vector<8x64xf32>
    %c0_14 = arith.constant 0 : index
    %c0_15 = arith.constant 0 : index
    %12 = vector.load %arg6[%c0_14, %c0_15] : memref<1x64xf32, #tpu.memory_space<vmem>>, vector<1x64xf32>
    %13 = vector.broadcast %12 : vector<1x64xf32> to vector<8x64xf32>
    %14 = arith.addf %11, %13 : vector<8x64xf32>
    %cst_16 = arith.constant 0.000000e+00 : f32
    %15 = vector.broadcast %cst_16 : f32 to vector<8x32xf32>
    %16 = vector.extract_strided_slice %10 {offsets = [0, 0], sizes = [8, 8], strides = [1, 1]} : vector<8x32xf32> to vector<8x8xf32>
    %17 = vector.extract_strided_slice %14 {offsets = [0, 0], sizes = [8, 8], strides = [1, 1]} : vector<8x64xf32> to vector<8x8xf32>
    %18 = vector.extract_strided_slice %14 {offsets = [0, 32], sizes = [8, 8], strides = [1, 1]} : vector<8x64xf32> to vector<8x8xf32>
    %cst_17 = arith.constant dense<0.000000e+00> : vector<8x8xf32>
    %19 = tpu.matmul %16, %17, %cst_17 {dimension_numbers = #tpu.dot_dimension_numbers<[1], [1], [0], [0], [0, 0, 1, 0], [], []>} : vector<8x8xf32>, vector<8x8xf32>, vector<8x8xf32> -> vector<8x8xf32>
    %cst_18 = arith.constant 0.353553385 : f32
    %20 = vector.broadcast %cst_18 : f32 to vector<8x8xf32>
    %21 = arith.mulf %19, %20 : vector<8x8xf32>
    %cst_19 = arith.constant dense<0xFF800000> : vector<8xf32>
    %22 = vector.multi_reduction <maximumf>, %21, %cst_19 [1] : vector<8x8xf32> to vector<8xf32>
    %23 = vector.shape_cast %22 : vector<8xf32> to vector<8x1xf32>
    %24 = vector.broadcast %23 : vector<8x1xf32> to vector<8x8xf32>
    %25 = arith.subf %21, %24 : vector<8x8xf32>
    %26 = math.exp %25 : vector<8x8xf32>
    %cst_20 = arith.constant dense<0.000000e+00> : vector<8xf32>
    %27 = vector.multi_reduction <add>, %26, %cst_20 [1] : vector<8x8xf32> to vector<8xf32>
    %28 = vector.shape_cast %27 : vector<8xf32> to vector<8x1xf32>
    %29 = tpu.reciprocal %28 {approx = true} : vector<8x1xf32> -> vector<8x1xf32>
    %30 = vector.broadcast %29 : vector<8x1xf32> to vector<8x8xf32>
    %31 = arith.mulf %26, %30 : vector<8x8xf32>
    %cst_21 = arith.constant dense<0.000000e+00> : vector<8x8xf32>
    %32 = tpu.matmul %31, %18, %cst_21 {dimension_numbers = #tpu.dot_dimension_numbers<[1], [0], [0], [1], [0, 0, 1, 1], [], []>} : vector<8x8xf32>, vector<8x8xf32>, vector<8x8xf32> -> vector<8x8xf32>
    %33 = vector.extract_strided_slice %6 {offsets = [0, 0], sizes = [8, 32], strides = [1, 1]} : vector<32x32xf32> to vector<8x32xf32>
    %cst_22 = arith.constant dense<0.000000e+00> : vector<8x32xf32>
    %34 = tpu.matmul %32, %33, %cst_22 {dimension_numbers = #tpu.dot_dimension_numbers<[1], [0], [0], [1], [0, 0, 1, 1], [], []>} : vector<8x8xf32>, vector<8x32xf32>, vector<8x32xf32> -> vector<8x32xf32>
    %35 = arith.addf %15, %34 : vector<8x32xf32>
    %36 = vector.extract_strided_slice %10 {offsets = [0, 8], sizes = [8, 8], strides = [1, 1]} : vector<8x32xf32> to vector<8x8xf32>
    %37 = vector.extract_strided_slice %14 {offsets = [0, 8], sizes = [8, 8], strides = [1, 1]} : vector<8x64xf32> to vector<8x8xf32>
    %38 = vector.extract_strided_slice %14 {offsets = [0, 40], sizes = [8, 8], strides = [1, 1]} : vector<8x64xf32> to vector<8x8xf32>
    %cst_23 = arith.constant dense<0.000000e+00> : vector<8x8xf32>
    %39 = tpu.matmul %36, %37, %cst_23 {dimension_numbers = #tpu.dot_dimension_numbers<[1], [1], [0], [0], [0, 0, 1, 0], [], []>} : vector<8x8xf32>, vector<8x8xf32>, vector<8x8xf32> -> vector<8x8xf32>
    %cst_24 = arith.constant 0.353553385 : f32
    %40 = vector.broadcast %cst_24 : f32 to vector<8x8xf32>
    %41 = arith.mulf %39, %40 : vector<8x8xf32>
    %cst_25 = arith.constant dense<0xFF800000> : vector<8xf32>
    %42 = vector.multi_reduction <maximumf>, %41, %cst_25 [1] : vector<8x8xf32> to vector<8xf32>
    %43 = vector.shape_cast %42 : vector<8xf32> to vector<8x1xf32>
    %44 = vector.broadcast %43 : vector<8x1xf32> to vector<8x8xf32>
    %45 = arith.subf %41, %44 : vector<8x8xf32>
    %46 = math.exp %45 : vector<8x8xf32>
    %cst_26 = arith.constant dense<0.000000e+00> : vector<8xf32>
    %47 = vector.multi_reduction <add>, %46, %cst_26 [1] : vector<8x8xf32> to vector<8xf32>
    %48 = vector.shape_cast %47 : vector<8xf32> to vector<8x1xf32>
    %49 = tpu.reciprocal %48 {approx = true} : vector<8x1xf32> -> vector<8x1xf32>
    %50 = vector.broadcast %49 : vector<8x1xf32> to vector<8x8xf32>
    %51 = arith.mulf %46, %50 : vector<8x8xf32>
    %cst_27 = arith.constant dense<0.000000e+00> : vector<8x8xf32>
    %52 = tpu.matmul %51, %38, %cst_27 {dimension_numbers = #tpu.dot_dimension_numbers<[1], [0], [0], [1], [0, 0, 1, 1], [], []>} : vector<8x8xf32>, vector<8x8xf32>, vector<8x8xf32> -> vector<8x8xf32>
    %53 = vector.extract_strided_slice %6 {offsets = [8, 0], sizes = [8, 32], strides = [1, 1]} : vector<32x32xf32> to vector<8x32xf32>
    %cst_28 = arith.constant dense<0.000000e+00> : vector<8x32xf32>
    %54 = tpu.matmul %52, %53, %cst_28 {dimension_numbers = #tpu.dot_dimension_numbers<[1], [0], [0], [1], [0, 0, 1, 1], [], []>} : vector<8x8xf32>, vector<8x32xf32>, vector<8x32xf32> -> vector<8x32xf32>
    %55 = arith.addf %35, %54 : vector<8x32xf32>
    %56 = vector.extract_strided_slice %10 {offsets = [0, 16], sizes = [8, 8], strides = [1, 1]} : vector<8x32xf32> to vector<8x8xf32>
    %57 = vector.extract_strided_slice %14 {offsets = [0, 16], sizes = [8, 8], strides = [1, 1]} : vector<8x64xf32> to vector<8x8xf32>
    %58 = vector.extract_strided_slice %14 {offsets = [0, 48], sizes = [8, 8], strides = [1, 1]} : vector<8x64xf32> to vector<8x8xf32>
    %cst_29 = arith.constant dense<0.000000e+00> : vector<8x8xf32>
    %59 = tpu.matmul %56, %57, %cst_29 {dimension_numbers = #tpu.dot_dimension_numbers<[1], [1], [0], [0], [0, 0, 1, 0], [], []>} : vector<8x8xf32>, vector<8x8xf32>, vector<8x8xf32> -> vector<8x8xf32>
    %cst_30 = arith.constant 0.353553385 : f32
    %60 = vector.broadcast %cst_30 : f32 to vector<8x8xf32>
    %61 = arith.mulf %59, %60 : vector<8x8xf32>
    %cst_31 = arith.constant dense<0xFF800000> : vector<8xf32>
    %62 = vector.multi_reduction <maximumf>, %61, %cst_31 [1] : vector<8x8xf32> to vector<8xf32>
    %63 = vector.shape_cast %62 : vector<8xf32> to vector<8x1xf32>
    %64 = vector.broadcast %63 : vector<8x1xf32> to vector<8x8xf32>
    %65 = arith.subf %61, %64 : vector<8x8xf32>
    %66 = math.exp %65 : vector<8x8xf32>
    %cst_32 = arith.constant dense<0.000000e+00> : vector<8xf32>
    %67 = vector.multi_reduction <add>, %66, %cst_32 [1] : vector<8x8xf32> to vector<8xf32>
    %68 = vector.shape_cast %67 : vector<8xf32> to vector<8x1xf32>
    %69 = tpu.reciprocal %68 {approx = true} : vector<8x1xf32> -> vector<8x1xf32>
    %70 = vector.broadcast %69 : vector<8x1xf32> to vector<8x8xf32>
    %71 = arith.mulf %66, %70 : vector<8x8xf32>
    %cst_33 = arith.constant dense<0.000000e+00> : vector<8x8xf32>
    %72 = tpu.matmul %71, %58, %cst_33 {dimension_numbers = #tpu.dot_dimension_numbers<[1], [0], [0], [1], [0, 0, 1, 1], [], []>} : vector<8x8xf32>, vector<8x8xf32>, vector<8x8xf32> -> vector<8x8xf32>
    %73 = vector.extract_strided_slice %6 {offsets = [16, 0], sizes = [8, 32], strides = [1, 1]} : vector<32x32xf32> to vector<8x32xf32>
    %cst_34 = arith.constant dense<0.000000e+00> : vector<8x32xf32>
    %74 = tpu.matmul %72, %73, %cst_34 {dimension_numbers = #tpu.dot_dimension_numbers<[1], [0], [0], [1], [0, 0, 1, 1], [], []>} : vector<8x8xf32>, vector<8x32xf32>, vector<8x32xf32> -> vector<8x32xf32>
    %75 = arith.addf %55, %74 : vector<8x32xf32>
    %76 = vector.extract_strided_slice %10 {offsets = [0, 24], sizes = [8, 8], strides = [1, 1]} : vector<8x32xf32> to vector<8x8xf32>
    %77 = vector.extract_strided_slice %14 {offsets = [0, 24], sizes = [8, 8], strides = [1, 1]} : vector<8x64xf32> to vector<8x8xf32>
    %78 = vector.extract_strided_slice %14 {offsets = [0, 56], sizes = [8, 8], strides = [1, 1]} : vector<8x64xf32> to vector<8x8xf32>
    %cst_35 = arith.constant dense<0.000000e+00> : vector<8x8xf32>
    %79 = tpu.matmul %76, %77, %cst_35 {dimension_numbers = #tpu.dot_dimension_numbers<[1], [1], [0], [0], [0, 0, 1, 0], [], []>} : vector<8x8xf32>, vector<8x8xf32>, vector<8x8xf32> -> vector<8x8xf32>
    %cst_36 = arith.constant 0.353553385 : f32
    %80 = vector.broadcast %cst_36 : f32 to vector<8x8xf32>
    %81 = arith.mulf %79, %80 : vector<8x8xf32>
    %cst_37 = arith.constant dense<0xFF800000> : vector<8xf32>
    %82 = vector.multi_reduction <maximumf>, %81, %cst_37 [1] : vector<8x8xf32> to vector<8xf32>
    %83 = vector.shape_cast %82 : vector<8xf32> to vector<8x1xf32>
    %84 = vector.broadcast %83 : vector<8x1xf32> to vector<8x8xf32>
    %85 = arith.subf %81, %84 : vector<8x8xf32>
    %86 = math.exp %85 : vector<8x8xf32>
    %cst_38 = arith.constant dense<0.000000e+00> : vector<8xf32>
    %87 = vector.multi_reduction <add>, %86, %cst_38 [1] : vector<8x8xf32> to vector<8xf32>
    %88 = vector.shape_cast %87 : vector<8xf32> to vector<8x1xf32>
    %89 = tpu.reciprocal %88 {approx = true} : vector<8x1xf32> -> vector<8x1xf32>
    %90 = vector.broadcast %89 : vector<8x1xf32> to vector<8x8xf32>
    %91 = arith.mulf %86, %90 : vector<8x8xf32>
    %cst_39 = arith.constant dense<0.000000e+00> : vector<8x8xf32>
    %92 = tpu.matmul %91, %78, %cst_39 {dimension_numbers = #tpu.dot_dimension_numbers<[1], [0], [0], [1], [0, 0, 1, 1], [], []>} : vector<8x8xf32>, vector<8x8xf32>, vector<8x8xf32> -> vector<8x8xf32>
    %93 = vector.extract_strided_slice %6 {offsets = [24, 0], sizes = [8, 32], strides = [1, 1]} : vector<32x32xf32> to vector<8x32xf32>
    %cst_40 = arith.constant dense<0.000000e+00> : vector<8x32xf32>
    %94 = tpu.matmul %92, %93, %cst_40 {dimension_numbers = #tpu.dot_dimension_numbers<[1], [0], [0], [1], [0, 0, 1, 1], [], []>} : vector<8x8xf32>, vector<8x32xf32>, vector<8x32xf32> -> vector<8x32xf32>
    %95 = arith.addf %75, %94 : vector<8x32xf32>
    %c0_41 = arith.constant 0 : index
    %c0_42 = arith.constant 0 : index
    %96 = vector.load %arg8[%c0_41, %c0_42] : memref<1x32xf32, #tpu.memory_space<vmem>>, vector<1x32xf32>
    %97 = vector.broadcast %96 : vector<1x32xf32> to vector<8x32xf32>
    %98 = arith.addf %95, %97 : vector<8x32xf32>
    %99 = arith.addf %1, %98 : vector<8x32xf32>
    %c0_43 = arith.constant 0 : index
    %c0_44 = arith.constant 0 : index
    %100 = vector.load %arg9[%c0_43, %c0_44] : memref<1x32xf32, #tpu.memory_space<vmem>>, vector<1x32xf32>
    %c0_45 = arith.constant 0 : index
    %c0_46 = arith.constant 0 : index
    %101 = vector.load %arg10[%c0_45, %c0_46] : memref<1x32xf32, #tpu.memory_space<vmem>>, vector<1x32xf32>
    %cst_47 = arith.constant dense<0.000000e+00> : vector<8xf32>
    %102 = vector.multi_reduction <add>, %99, %cst_47 [1] : vector<8x32xf32> to vector<8xf32>
    %103 = vector.shape_cast %102 : vector<8xf32> to vector<8x1xf32>
    %cst_48 = arith.constant 3.200000e+01 : f32
    %104 = vector.broadcast %cst_48 : f32 to vector<8x1xf32>
    %105 = arith.divf %103, %104 : vector<8x1xf32>
    %106 = vector.broadcast %105 : vector<8x1xf32> to vector<8x32xf32>
    %107 = arith.subf %99, %106 : vector<8x32xf32>
    %108 = arith.mulf %107, %107 : vector<8x32xf32>
    %cst_49 = arith.constant dense<0.000000e+00> : vector<8xf32>
    %109 = vector.multi_reduction <add>, %108, %cst_49 [1] : vector<8x32xf32> to vector<8xf32>
    %110 = vector.shape_cast %109 : vector<8xf32> to vector<8x1xf32>
    %cst_50 = arith.constant 3.200000e+01 : f32
    %111 = vector.broadcast %cst_50 : f32 to vector<8x1xf32>
    %112 = arith.divf %110, %111 : vector<8x1xf32>
    %cst_51 = arith.constant 9.99999974E-6 : f32
    %113 = vector.broadcast %cst_51 : f32 to vector<8x1xf32>
    %114 = arith.addf %112, %113 : vector<8x1xf32>
    %115 = math.rsqrt %114 : vector<8x1xf32>
    %116 = vector.broadcast %115 : vector<8x1xf32> to vector<8x32xf32>
    %117 = arith.mulf %107, %116 : vector<8x32xf32>
    %118 = vector.broadcast %100 : vector<1x32xf32> to vector<8x32xf32>
    %119 = arith.mulf %117, %118 : vector<8x32xf32>
    %120 = vector.broadcast %101 : vector<1x32xf32> to vector<8x32xf32>
    %121 = arith.addf %119, %120 : vector<8x32xf32>
    %c0_52 = arith.constant 0 : index
    %c0_53 = arith.constant 0 : index
    %c0_54 = arith.constant 0 : index
    %122 = vector.load %arg11[%c0_52, %c0_53, %c0_54] : memref<1x8x32xf32, #tpu.memory_space<vmem>>, vector<1x8x32xf32>
    %123 = vector.shape_cast %122 : vector<1x8x32xf32> to vector<8x32xf32>
    %124 = vector.shape_cast %121 : vector<8x32xf32> to vector<1x8x32xf32>
    tpu.vector_store %arg11[%c0_52, %c0_53, %c0_54], %124 {strides = array<i32>} : memref<1x8x32xf32, #tpu.memory_space<vmem>>, vector<1x8x32xf32>,
    return
  }
  func.func @transform_0(%arg0: i32) -> (i32, i32, i32) {
    %c0_i32 = arith.constant 0 : i32
    %c0_i32_0 = arith.constant 0 : i32
    %c0_i32_1 = arith.constant 0 : i32
    return %arg0, %c0_i32, %c0_i32_0 : i32, i32, i32
  }
  func.func @transform_1(%arg0: i32) -> (i32, i32, i32) {
    %c0_i32 = arith.constant 0 : i32
    %c0_i32_0 = arith.constant 0 : i32
    %c0_i32_1 = arith.constant 0 : i32
    return %arg0, %c0_i32, %c0_i32_0 : i32, i32, i32
  }
  func.func @transform_2(%arg0: i32) -> (i32, i32) {
    %c0_i32 = arith.constant 0 : i32
    %c0_i32_0 = arith.constant 0 : i32
    %c0_i32_1 = arith.constant 0 : i32
    return %c0_i32, %c0_i32_0 : i32, i32
  }
  func.func @transform_3(%arg0: i32) -> (i32, i32) {
    %c0_i32 = arith.constant 0 : i32
    %c0_i32_0 = arith.constant 0 : i32
    %c0_i32_1 = arith.constant 0 : i32
    return %c0_i32, %c0_i32_0 : i32, i32
  }
  func.func @transform_4(%arg0: i32) -> (i32, i32) {
    %c0_i32 = arith.constant 0 : i32
    %c0_i32_0 = arith.constant 0 : i32
    %c0_i32_1 = arith.constant 0 : i32
    return %c0_i32, %c0_i32_0 : i32, i32
  }
  func.func @transform_5(%arg0: i32) -> (i32, i32) {
    %c0_i32 = arith.constant 0 : i32
    %c0_i32_0 = arith.constant 0 : i32
    %c0_i32_1 = arith.constant 0 : i32
    return %c0_i32, %c0_i32_0 : i32, i32
  }
  func.func @transform_6(%arg0: i32) -> (i32, i32) {
    %c0_i32 = arith.constant 0 : i32
    %c0_i32_0 = arith.constant 0 : i32
    %c0_i32_1 = arith.constant 0 : i32
    return %c0_i32, %c0_i32_0 : i32, i32
  }
  func.func @transform_7(%arg0: i32) -> (i32, i32) {
    %c0_i32 = arith.constant 0 : i32
    %c0_i32_0 = arith.constant 0 : i32
    %c0_i32_1 = arith.constant 0 : i32
    return %c0_i32, %c0_i32_0 : i32, i32
  }
  func.func @transform_8(%arg0: i32) -> (i32, i32) {
    %c0_i32 = arith.constant 0 : i32
    %c0_i32_0 = arith.constant 0 : i32
    %c0_i32_1 = arith.constant 0 : i32
    return %c0_i32, %c0_i32_0 : i32, i32
  }
  func.func @transform_9(%arg0: i32) -> (i32, i32) {
    %c0_i32 = arith.constant 0 : i32
    %c0_i32_0 = arith.constant 0 : i32
    %c0_i32_1 = arith.constant 0 : i32
    return %c0_i32, %c0_i32_0 : i32, i32
  }
  func.func @transform_10(%arg0: i32) -> (i32, i32, i32) {
    %c0_i32 = arith.constant 0 : i32
    %c0_i32_0 = arith.constant 0 : i32
    %c0_i32_1 = arith.constant 0 : i32
    return %arg0, %c0_i32, %c0_i32_0 : i32, i32, i32
  }
}

module attributes {stable_mosaic.version = 11 : i64} {
  func.func @_ffn_ln_kernel(%arg0: i32, %arg1: memref<16x32xf32, #tpu.memory_space<vmem>>, %arg2: memref<32x64xf32, #tpu.memory_space<vmem>>, %arg3: memref<1x64xf32, #tpu.memory_space<vmem>>, %arg4: memref<64x32xf32, #tpu.memory_space<vmem>>, %arg5: memref<1x32xf32, #tpu.memory_space<vmem>>, %arg6: memref<1x32xf32, #tpu.memory_space<vmem>>, %arg7: memref<1x32xf32, #tpu.memory_space<vmem>>, %arg8: memref<16x32xf32, #tpu.memory_space<vmem>>) attributes {dimension_semantics = [#tpu.dimension_semantics<parallel>], iteration_bounds = array<i64: 1>, scalar_prefetch = 0 : i64, scratch_operands = 0 : i64, tpu.core_type = #tpu.core_type<tc>, window_params = [{transform_indices = @transform_0, window_bounds = array<i64: 16, 32>}, {pipeline_mode = #tpu.pipeline_mode<synchronous>, transform_indices = @transform_1, window_bounds = array<i64: 32, 64>}, {pipeline_mode = #tpu.pipeline_mode<synchronous>, transform_indices = @transform_2, window_bounds = array<i64: 1, 64>}, {pipeline_mode = #tpu.pipeline_mode<synchronous>, transform_indices = @transform_3, window_bounds = array<i64: 64, 32>}, {pipeline_mode = #tpu.pipeline_mode<synchronous>, transform_indices = @transform_4, window_bounds = array<i64: 1, 32>}, {pipeline_mode = #tpu.pipeline_mode<synchronous>, transform_indices = @transform_5, window_bounds = array<i64: 1, 32>}, {pipeline_mode = #tpu.pipeline_mode<synchronous>, transform_indices = @transform_6, window_bounds = array<i64: 1, 32>}, {transform_indices = @transform_7, window_bounds = array<i64: 16, 32>}]} {
    %c0 = arith.constant 0 : index
    %c0_0 = arith.constant 0 : index
    %0 = vector.load %arg1[%c0, %c0_0] : memref<16x32xf32, #tpu.memory_space<vmem>>, vector<16x32xf32>
    %c0_1 = arith.constant 0 : index
    %c0_2 = arith.constant 0 : index
    %1 = vector.load %arg2[%c0_1, %c0_2] : memref<32x64xf32, #tpu.memory_space<vmem>>, vector<32x64xf32>
    %cst = arith.constant dense<0.000000e+00> : vector<16x64xf32>
    %2 = tpu.matmul %0, %1, %cst {dimension_numbers = #tpu.dot_dimension_numbers<[1], [0], [0], [1], [0, 0, 1, 1], [], []>} : vector<16x32xf32>, vector<32x64xf32>, vector<16x64xf32> -> vector<16x64xf32>
    %c0_3 = arith.constant 0 : index
    %c0_4 = arith.constant 0 : index
    %3 = vector.load %arg3[%c0_3, %c0_4] : memref<1x64xf32, #tpu.memory_space<vmem>>, vector<1x64xf32>
    %4 = vector.broadcast %3 : vector<1x64xf32> to vector<16x64xf32>
    %5 = arith.addf %2, %4 : vector<16x64xf32>
    %cst_5 = arith.constant 0.000000e+00 : f32
    %6 = vector.broadcast %cst_5 : f32 to vector<16x64xf32>
    %7 = arith.maximumf %5, %6 : vector<16x64xf32>
    %c0_6 = arith.constant 0 : index
    %c0_7 = arith.constant 0 : index
    %8 = vector.load %arg4[%c0_6, %c0_7] : memref<64x32xf32, #tpu.memory_space<vmem>>, vector<64x32xf32>
    %cst_8 = arith.constant dense<0.000000e+00> : vector<16x32xf32>
    %9 = tpu.matmul %7, %8, %cst_8 {dimension_numbers = #tpu.dot_dimension_numbers<[1], [0], [0], [1], [0, 0, 1, 1], [], []>} : vector<16x64xf32>, vector<64x32xf32>, vector<16x32xf32> -> vector<16x32xf32>
    %c0_9 = arith.constant 0 : index
    %c0_10 = arith.constant 0 : index
    %10 = vector.load %arg5[%c0_9, %c0_10] : memref<1x32xf32, #tpu.memory_space<vmem>>, vector<1x32xf32>
    %11 = vector.broadcast %10 : vector<1x32xf32> to vector<16x32xf32>
    %12 = arith.addf %9, %11 : vector<16x32xf32>
    %13 = arith.addf %0, %12 : vector<16x32xf32>
    %c0_11 = arith.constant 0 : index
    %c0_12 = arith.constant 0 : index
    %14 = vector.load %arg6[%c0_11, %c0_12] : memref<1x32xf32, #tpu.memory_space<vmem>>, vector<1x32xf32>
    %c0_13 = arith.constant 0 : index
    %c0_14 = arith.constant 0 : index
    %15 = vector.load %arg7[%c0_13, %c0_14] : memref<1x32xf32, #tpu.memory_space<vmem>>, vector<1x32xf32>
    %cst_15 = arith.constant dense<0.000000e+00> : vector<16xf32>
    %16 = vector.multi_reduction <add>, %13, %cst_15 [1] : vector<16x32xf32> to vector<16xf32>
    %17 = vector.shape_cast %16 : vector<16xf32> to vector<16x1xf32>
    %cst_16 = arith.constant 3.200000e+01 : f32
    %18 = vector.broadcast %cst_16 : f32 to vector<16x1xf32>
    %19 = arith.divf %17, %18 : vector<16x1xf32>
    %20 = vector.broadcast %19 : vector<16x1xf32> to vector<16x32xf32>
    %21 = arith.subf %13, %20 : vector<16x32xf32>
    %22 = arith.mulf %21, %21 : vector<16x32xf32>
    %cst_17 = arith.constant dense<0.000000e+00> : vector<16xf32>
    %23 = vector.multi_reduction <add>, %22, %cst_17 [1] : vector<16x32xf32> to vector<16xf32>
    %24 = vector.shape_cast %23 : vector<16xf32> to vector<16x1xf32>
    %cst_18 = arith.constant 3.200000e+01 : f32
    %25 = vector.broadcast %cst_18 : f32 to vector<16x1xf32>
    %26 = arith.divf %24, %25 : vector<16x1xf32>
    %cst_19 = arith.constant 9.99999974E-6 : f32
    %27 = vector.broadcast %cst_19 : f32 to vector<16x1xf32>
    %28 = arith.addf %26, %27 : vector<16x1xf32>
    %29 = math.rsqrt %28 : vector<16x1xf32>
    %30 = vector.broadcast %29 : vector<16x1xf32> to vector<16x32xf32>
    %31 = arith.mulf %21, %30 : vector<16x32xf32>
    %32 = vector.broadcast %14 : vector<1x32xf32> to vector<16x32xf32>
    %33 = arith.mulf %31, %32 : vector<16x32xf32>
    %34 = vector.broadcast %15 : vector<1x32xf32> to vector<16x32xf32>
    %35 = arith.addf %33, %34 : vector<16x32xf32>
    %c0_20 = arith.constant 0 : index
    %c0_21 = arith.constant 0 : index
    %36 = vector.load %arg8[%c0_20, %c0_21] : memref<16x32xf32, #tpu.memory_space<vmem>>, vector<16x32xf32>
    tpu.vector_store %arg8[%c0_20, %c0_21], %35 {strides = array<i32>} : memref<16x32xf32, #tpu.memory_space<vmem>>, vector<16x32xf32>,
    return
  }
  func.func @transform_0(%arg0: i32) -> (i32, i32) {
    %c0_i32 = arith.constant 0 : i32
    %c0_i32_0 = arith.constant 0 : i32
    return %arg0, %c0_i32 : i32, i32
  }
  func.func @transform_1(%arg0: i32) -> (i32, i32) {
    %c0_i32 = arith.constant 0 : i32
    %c0_i32_0 = arith.constant 0 : i32
    %c0_i32_1 = arith.constant 0 : i32
    return %c0_i32, %c0_i32_0 : i32, i32
  }
  func.func @transform_2(%arg0: i32) -> (i32, i32) {
    %c0_i32 = arith.constant 0 : i32
    %c0_i32_0 = arith.constant 0 : i32
    %c0_i32_1 = arith.constant 0 : i32
    return %c0_i32, %c0_i32_0 : i32, i32
  }
  func.func @transform_3(%arg0: i32) -> (i32, i32) {
    %c0_i32 = arith.constant 0 : i32
    %c0_i32_0 = arith.constant 0 : i32
    %c0_i32_1 = arith.constant 0 : i32
    return %c0_i32, %c0_i32_0 : i32, i32
  }
  func.func @transform_4(%arg0: i32) -> (i32, i32) {
    %c0_i32 = arith.constant 0 : i32
    %c0_i32_0 = arith.constant 0 : i32
    %c0_i32_1 = arith.constant 0 : i32
    return %c0_i32, %c0_i32_0 : i32, i32
  }
  func.func @transform_5(%arg0: i32) -> (i32, i32) {
    %c0_i32 = arith.constant 0 : i32
    %c0_i32_0 = arith.constant 0 : i32
    %c0_i32_1 = arith.constant 0 : i32
    return %c0_i32, %c0_i32_0 : i32, i32
  }
  func.func @transform_6(%arg0: i32) -> (i32, i32) {
    %c0_i32 = arith.constant 0 : i32
    %c0_i32_0 = arith.constant 0 : i32
    %c0_i32_1 = arith.constant 0 : i32
    return %c0_i32, %c0_i32_0 : i32, i32
  }
  func.func @transform_7(%arg0: i32) -> (i32, i32) {
    %c0_i32 = arith.constant 0 : i32
    %c0_i32_0 = arith.constant 0 : i32
    return %arg0, %c0_i32 : i32, i32
  }
}

</mosaic_0001>

<bundles_post_ra>
// kernel: _lambda_.9
= control target key start
LH: loop header
LB: loop body
LE: loop exit
PB: predicated region body
PF: predicated region fallthrough
CT: control target
= control target key end

     0   :  { %vm18_vm0 = vcmask 261120   ;;  %v95_v4 = vmov 32.0   ;;  %s140_s0 = inlined_call_operand.vmem [shape: f32[16,32], index: 0, kind: input, shape index: {}]   ;;  %s141_s1 = inlined_call_operand.vmem [shape: f32[1,32], index: 1, kind: input, shape index: {}]   ;;  %s142_s2 = inlined_call_operand.vmem [shape: f32[1,32], index: 2, kind: input, shape index: {}]   ;;  %s143_s3 = inlined_call_operand.vmem [shape: f32[16,32], index: 3, kind: output, shape index: {}]  }
   0x1   :  { %v14_v0 = vld [vmem:[%s140_s0] sm:$0xff]  ;;  %v15_v2 = vld [vmem:[%s140_s0 + $0x8] sm:$0xff]  ;;  %89 = vrcp.f32 %v95_v4 }
   0x2   :  { %v19_v1 = vsel %vm18_vm0, %v14_v0, 0.0  ;;  %v22_v3 = vsel %vm18_vm0, %v15_v2, 0.0  ;;  %v87_v35 = vld [vmem:[%s141_s1] ss:$0 sm:$0xff] }
   0x3   :  { %20 = vadd.xlane.f32.xlu0 %v19_v1  ;;  %v88_v38 = vld [vmem:[%s142_s2] ss:$0 sm:$0xff] }
   0x7   :  { %v90_v5 = vpop.eup %89 }
   0x8   :  { %v26_v6 = vmul.f32 32.0, %v90_v5  ;;  %vm30_vm1 = vweird.f32 %v90_v5 }
   0xa   :  { %v27_v7 = vsub.f32 1.0, %v26_v6 }
   0xb   :  { %23 = vadd.xlane.f32.xlu0 %v22_v3 }
   0xc   :  { %v28_v8 = vmul.f32 %v90_v5, %v27_v7 }
   0xe   :  { %v29_v9 = vadd.f32 %v90_v5, %v28_v8 }
  0x10   :  { %v31_v10 = vsel %vm30_vm1, %v90_v5, %v29_v9 }
  0x76   :  { %v21_v11 = vpop.xlane.xlu0 %20 }
  0x77   :  { %v32_v12 = vmul.f32 %v31_v10, %v21_v11 }
  0x79   :  { %v34_v13 = vsub.f32 %v14_v0, %v32_v12 }
  0x7b   :  { %v36_v14 = vmul.f32 %v34_v13, %v34_v13 }
  0x7d   :  { %v38_v15 = vsel %vm18_vm0, %v36_v14, 0.0 }
  0x7e   :  { %39 = vadd.xlane.f32.xlu1 %v38_v15  ;;  %v24_v16 = vpop.xlane.xlu0 %23 }
  0x7f   :  { %v33_v17 = vmul.f32 %v31_v10, %v24_v16 }
  0x81   :  { %v35_v18 = vsub.f32 %v15_v2, %v33_v17 }
  0x83   :  { %v37_v19 = vmul.f32 %v35_v18, %v35_v18 }
  0x85   :  { %v41_v20 = vsel %vm18_vm0, %v37_v19, 0.0 }
  0x86   :  { %42 = vadd.xlane.f32.xlu1 %v41_v20 }
  0xf1   :  { %v40_v21 = vpop.xlane.xlu1 %39 }
  0xf2   :  { %v44_v22 = vmul.f32 %v40_v21, %v31_v10 }
  0xf4   :  { %v46_v23 = vadd.f32 1e-05, %v44_v22 }
  0xf6   :  { %91 = vrsqrt.f32 %v46_v23  ;;  %vm54_vm3 = vweird.f32 %v46_v23 }
  0xf9   :  { %v43_v24 = vpop.xlane.xlu1 %42 }
  0xfa   :  { %v45_v25 = vmul.f32 %v43_v24, %v31_v10 }
  0xfc   :  { %v92_v26 = vpop.eup %91  ;;  %v47_v27 = vadd.f32 1e-05, %v45_v25 }
  0xfd   :  { %v49_v28 = vmul.f32 %v92_v26, %v46_v23  ;;  %vm55_vm2 = vweird.f32 %v92_v26 }
  0xfe   :  { %93 = vrsqrt.f32 %v47_v27  ;;  %vm56_vm4 = vmor %vm54_vm3, %vm55_vm2  ;;  %vm64_vm6 = vweird.f32 %v47_v27 }
  0xff   :  { %v50_v29 = vmul.f32 %v92_v26, %v49_v28 }
 0x101   :  { %v51_v30 = vmul.f32 0.5, %v50_v29 }
 0x103   :  { %v52_v31 = vsub.f32 1.5, %v51_v30 }
 0x104   :  { %v94_v32 = vpop.eup %93 }
 0x105   :  { %v53_v33 = vmul.f32 %v92_v26, %v52_v31  ;;  %v59_v34 = vmul.f32 %v94_v32, %v47_v27  ;;  %vm65_vm5 = vweird.f32 %v94_v32 }
 0x106   :  { %vm66_vm7 = vmor %vm64_vm6, %vm65_vm5 }
 0x107   :  { %v57_v36 = vsel %vm56_vm4, %v92_v26, %v53_v33  ;;  %v60_v37 = vmul.f32 %v94_v32, %v59_v34 }
 0x108   :  { %v68_v39 = vmul.f32 %v57_v36, %v34_v13 }
 0x109   :  { %v61_v40 = vmul.f32 0.5, %v60_v37 }
 0x10a   :  { %v73_v41 = vmul.f32 %v87_v35, %v68_v39 }
 0x10b   :  { %v62_v42 = vsub.f32 1.5, %v61_v40 }
 0x10c   :  { %v78_v43 = vadd.f32 %v88_v38, %v73_v41 }
 0x10d   :  { %v63_v44 = vmul.f32 %v94_v32, %v62_v42 }
 0x10e   :  { %80 = vst.msk [vmem:[%s143_s3] sm:$0xff] %vm18_vm0, %v78_v43 }
 0x10f   :  { %v67_v45 = vsel %vm66_vm7, %v94_v32, %v63_v44 }
 0x110   :  { %v69_v46 = vmul.f32 %v67_v45, %v35_v18 }
 0x112   :  { %v74_v47 = vmul.f32 %v87_v35, %v69_v46 }
 0x114   :  { %v79_v48 = vadd.f32 %v88_v38, %v74_v47 }
 0x116   :  { %81 = vst.msk [vmem:[%s143_s3 + $0x8] sm:$0xff] %vm18_vm0, %v79_v48 }

// kernel: _lambda_.6
= control target key start
LH: loop header
LB: loop body
LE: loop exit
PB: predicated region body
PF: predicated region fallthrough
CT: control target
= control target key end

     0   :  { %vm36_vm0 = vcmask 261120   ;;  %vm80_vm1 = vcmask 523264   ;;  %v208_v30 = vmov 32.0   ;;  %s317_s1 = inlined_call_operand.vmem [shape: f32[32,64], index: 1, kind: input, shape index: {}]   ;;  %s318_s3 = inlined_call_operand.vmem [shape: f32[64,32], index: 3, kind: input, shape index: {}]   ;;  %s319_s0 = inlined_call_operand.vmem [shape: f32[16,32], index: 0, kind: input, shape index: {}]   ;;  %s320_s2 = inlined_call_operand.vmem [shape: f32[1,64], index: 2, kind: input, shape index: {}]   ;;  %s321_s4 = inlined_call_operand.vmem [shape: f32[1,32], index: 4, kind: input, shape index: {}]   ;;  %s322_s5 = inlined_call_operand.vmem [shape: f32[1,32], index: 5, kind: input, shape index: {}]   ;;  %s323_s6 = inlined_call_operand.vmem [shape: f32[1,32], index: 6, kind: input, shape index: {}]   ;;  %s324_s7 = inlined_call_operand.vmem [shape: f32[16,32], index: 7, kind: output, shape index: {}]  }
   0x1   :  { %v31_v0 = vld [vmem:[%s317_s1 + $0x18] sm:$0xff]  ;;  %v30_v1 = vld [vmem:[%s317_s1 + $0x10] sm:$0xff]  ;;  %v29_v2 = vld [vmem:[%s317_s1 + $0x8] sm:$0xff]  ;;  %202 = vrcp.f32 %v208_v30 }
   0x2   :  { %55 = vmatpush.msra.mxu0 %v31_v0  ;;  %185 = vmatpush.msra.mxu3 %v31_v0  ;;  %v75_v3 = vld [vmem:[%s318_s3 + $0x38] sm:$0xff]  ;;  %v74_v4 = vld [vmem:[%s318_s3 + $0x30] sm:$0xff]  ;;  %v28_v5 = vld [vmem:[%s317_s1] sm:$0xff] }
   0x3   :  { %95 = vmatpush.msra.mxu1 %v75_v3  ;;  %189 = vmatpush.msra.mxu2 %v75_v3  ;;  %v26_v6 = vld [vmem:[%s319_s0] sm:$0xff]  ;;  %v27_v7 = vld [vmem:[%s319_s0 + $0x8] sm:$0xff]  ;;  %v71_v10 = vld [vmem:[%s318_s3 + $0x18] sm:$0xff] }
   0x4   :  { %56 = vmatpush.msra.mxu0 %v30_v1  ;;  %186 = vmatpush.msra.mxu3 %v30_v1  ;;  %v73_v8 = vld [vmem:[%s318_s3 + $0x28] sm:$0xff]  ;;  %v72_v9 = vld [vmem:[%s318_s3 + $0x20] sm:$0xff]  ;;  %v70_v11 = vld [vmem:[%s318_s3 + $0x10] sm:$0xff] }
   0x5   :  { %96 = vmatpush.msra.mxu1 %v74_v4  ;;  %190 = vmatpush.msra.mxu2 %v74_v4  ;;  %v69_v12 = vld [vmem:[%s318_s3 + $0x8] sm:$0xff]  ;;  %v68_v13 = vld [vmem:[%s318_s3] sm:$0xff] }
   0x6   :  { %57 = vmatpush.msra.mxu0 %v29_v2  ;;  %187 = vmatpush.msra.mxu3 %v29_v2  ;;  %v198_v14 = vld [vmem:[%s320_s2] ss:$0 sm:$0xff] }
   0x7   :  { %97 = vmatpush.msra.mxu1 %v73_v8  ;;  %191 = vmatpush.msra.mxu2 %v73_v8  ;;  %v199_v21 = vld [vmem:[%s321_s4] ss:$0 sm:$0xff]  ;;  %v203_v31 = vpop.eup %202 }
   0x8   :  { %58 = vmatpush.msra.mxu0 %v28_v5  ;;  %188 = vmatpush.msra.mxu3 %v28_v5  ;;  %v121_v32 = vmul.f32 32.0, %v203_v31  ;;  %vm125_vm2 = vweird.f32 %v203_v31  ;;  %v200_v59 = vld [vmem:[%s322_s5] ss:$0 sm:$0xff] }
   0x9   :  { %181 = vmatmul.msk.f32.vlgmr.msra.gmra.mxu0 %vm36_vm0, %v26_v6  ;;  %182 = vmatmul.msk.f32.vlgmr.msra.gmra.mxu3 %vm36_vm0, %v27_v7  ;;  %v201_v62 = vld [vmem:[%s323_s6] ss:$0 sm:$0xff] }
   0xa   :  { %98 = vmatpush.msra.mxu1 %v72_v9  ;;  %192 = vmatpush.msra.mxu2 %v72_v9  ;;  %v122_v33 = vsub.f32 1.0, %v121_v32 }
   0xc   :  { %99 = vmatpush.msra.mxu1 %v71_v10  ;;  %193 = vmatpush.msra.mxu2 %v71_v10  ;;  %v123_v34 = vmul.f32 %v203_v31, %v122_v33 }
   0xe   :  { %100 = vmatpush.msra.mxu1 %v70_v11  ;;  %194 = vmatpush.msra.mxu2 %v70_v11  ;;  %v124_v35 = vadd.f32 %v203_v31, %v123_v34 }
  0x10   :  { %101 = vmatpush.msra.mxu1 %v69_v12  ;;  %195 = vmatpush.msra.mxu2 %v69_v12  ;;  %v126_v36 = vsel %vm125_vm2, %v203_v31, %v124_v35 }
  0x12   :  { %102 = vmatpush.msra.mxu1 %v68_v13  ;;  %196 = vmatpush.msra.mxu2 %v68_v13 }
  0x86   :  { %v60_v15 = vpop.f32.mrf.mxu0 }
  0x87   :  { %v61_v16 = vadd.f32 %v198_v14, %v60_v15 }
  0x89   :  { %v66_v17 = vmax.f32 %v61_v16, 0.0 }
  0x8b   :  { %183 = vmatmul.msk.f32.vlgmr.msra.gmra.mxu1 %vm80_vm1, %v66_v17 }
  0x8c   :  { %v63_v18 = vpop.f32.mrf.mxu3 }
  0x8d   :  { %v64_v19 = vadd.f32 %v198_v14, %v63_v18 }
  0x8f   :  { %v67_v20 = vmax.f32 %v64_v19, 0.0 }
  0x91   :  { %184 = vmatmul.msk.f32.vlgmr.msra.gmra.mxu2 %vm80_vm1, %v67_v20 }
 0x108   :  { %v104_v22 = vpop.f32.mrf.mxu1 }
 0x109   :  { %v105_v23 = vadd.f32 %v199_v21, %v104_v22 }
 0x10b   :  { %v110_v24 = vadd.f32 %v105_v23, %v26_v6 }
 0x10d   :  { %v114_v25 = vsel %vm36_vm0, %v110_v24, 0.0 }
 0x10e   :  { %115 = vadd.xlane.f32.xlu0 %v114_v25 }
 0x114   :  { %v107_v26 = vpop.f32.mrf.mxu2 }
 0x115   :  { %v108_v27 = vadd.f32 %v199_v21, %v107_v26 }
 0x117   :  { %v111_v28 = vadd.f32 %v108_v27, %v27_v7 }
 0x119   :  { %v117_v29 = vsel %vm36_vm0, %v111_v28, 0.0 }
 0x11a   :  { %118 = vadd.xlane.f32.xlu0 %v117_v29 }
 0x181   :  { %v116_v37 = vpop.xlane.xlu0 %115 }
 0x182   :  { %v127_v38 = vmul.f32 %v126_v36, %v116_v37 }
 0x184   :  { %v129_v39 = vsub.f32 %v110_v24, %v127_v38 }
 0x186   :  { %v131_v40 = vmul.f32 %v129_v39, %v129_v39 }
 0x188   :  { %v133_v41 = vsel %vm36_vm0, %v131_v40, 0.0 }
 0x189   :  { %134 = vadd.xlane.f32.xlu1 %v133_v41 }
 0x18d   :  { %v119_v42 = vpop.xlane.xlu0 %118 }
 0x18e   :  { %v128_v43 = vmul.f32 %v126_v36, %v119_v42 }
 0x190   :  { %v130_v44 = vsub.f32 %v111_v28, %v128_v43 }
 0x192   :  { %v132_v45 = vmul.f32 %v130_v44, %v130_v44 }
 0x194   :  { %v136_v46 = vsel %vm36_vm0, %v132_v45, 0.0 }
 0x195   :  { %137 = vadd.xlane.f32.xlu1 %v136_v46 }
 0x1fc   :  { %v135_v47 = vpop.xlane.xlu1 %134 }
 0x1fd   :  { %v139_v48 = vmul.f32 %v135_v47, %v126_v36 }
 0x1ff   :  { %v141_v49 = vadd.f32 1e-05, %v139_v48 }
 0x201   :  { %204 = vrsqrt.f32 %v141_v49  ;;  %vm149_vm4 = vweird.f32 %v141_v49 }
 0x207   :  { %v205_v50 = vpop.eup %204 }
 0x208   :  { %v144_v51 = vmul.f32 %v205_v50, %v141_v49  ;;  %v138_v52 = vpop.xlane.xlu1 %137  ;;  %vm150_vm3 = vweird.f32 %v205_v50 }
 0x209   :  { %v140_v53 = vmul.f32 %v138_v52, %v126_v36  ;;  %vm151_vm5 = vmor %vm149_vm4, %vm150_vm3 }
 0x20a   :  { %v145_v54 = vmul.f32 %v205_v50, %v144_v51 }
 0x20b   :  { %v142_v55 = vadd.f32 1e-05, %v140_v53 }
 0x20c   :  { %v146_v56 = vmul.f32 0.5, %v145_v54 }
 0x20d   :  { %206 = vrsqrt.f32 %v142_v55  ;;  %vm159_vm7 = vweird.f32 %v142_v55 }
 0x20e   :  { %v147_v57 = vsub.f32 1.5, %v146_v56 }
 0x210   :  { %v148_v58 = vmul.f32 %v205_v50, %v147_v57 }
 0x212   :  { %v152_v60 = vsel %vm151_vm5, %v205_v50, %v148_v58 }
 0x213   :  { %v207_v61 = vpop.eup %206  ;;  %v163_v63 = vmul.f32 %v152_v60, %v129_v39 }
 0x214   :  { %v154_v0 = vmul.f32 %v207_v61, %v142_v55  ;;  %vm160_vm6 = vweird.f32 %v207_v61 }
 0x215   :  { %v168_v1 = vmul.f32 %v200_v59, %v163_v63  ;;  %vm161_vm8 = vmor %vm159_vm7, %vm160_vm6 }
 0x216   :  { %v155_v2 = vmul.f32 %v207_v61, %v154_v0 }
 0x217   :  { %v173_v3 = vadd.f32 %v201_v62, %v168_v1 }
 0x218   :  { %v156_v4 = vmul.f32 0.5, %v155_v2 }
 0x219   :  { %175 = vst.msk [vmem:[%s324_s7] sm:$0xff] %vm36_vm0, %v173_v3 }
 0x21a   :  { %v157_v5 = vsub.f32 1.5, %v156_v4 }
 0x21c   :  { %v158_v6 = vmul.f32 %v207_v61, %v157_v5 }
 0x21e   :  { %v162_v7 = vsel %vm161_vm8, %v207_v61, %v158_v6 }
 0x21f   :  { %v164_v8 = vmul.f32 %v162_v7, %v130_v44 }
 0x221   :  { %v169_v9 = vmul.f32 %v200_v59, %v164_v8 }
 0x223   :  { %v174_v10 = vadd.f32 %v201_v62, %v169_v9 }
 0x225   :  { %176 = vst.msk [vmem:[%s324_s7 + $0x8] sm:$0xff] %vm36_vm0, %v174_v10 }

// kernel: _lambda_.5
= control target key start
LH: loop header
LB: loop body
LE: loop exit
PB: predicated region body
PF: predicated region fallthrough
CT: control target
= control target key end

     0   :  { %s1049_s13 = smov 0   ;;  %s1171_s0 = inlined_call_operand.vmem [shape: f32[2,8,32], index: 0, kind: input, shape index: {}]   ;;  %s1172_s1 = inlined_call_operand.vmem [shape: f32[2,8,32], index: 1, kind: input, shape index: {}]   ;;  %s1173_s2 = inlined_call_operand.vmem [shape: f32[32,32], index: 2, kind: input, shape index: {}]   ;;  %s1174_s3 = inlined_call_operand.vmem [shape: f32[1,32], index: 3, kind: input, shape index: {}]   ;;  %s1175_s4 = inlined_call_operand.vmem [shape: f32[32,64], index: 4, kind: input, shape index: {}]   ;;  %s1176_s5 = inlined_call_operand.vmem [shape: f32[1,64], index: 5, kind: input, shape index: {}]   ;;  %s1177_s6 = inlined_call_operand.vmem [shape: f32[32,32], index: 6, kind: input, shape index: {}]   ;;  %s1178_s7 = inlined_call_operand.vmem [shape: f32[1,32], index: 7, kind: input, shape index: {}]   ;;  %s1179_s8 = inlined_call_operand.vmem [shape: f32[1,32], index: 8, kind: input, shape index: {}]   ;;  %s1180_s9 = inlined_call_operand.vmem [shape: f32[1,32], index: 9, kind: input, shape index: {}]   ;;  %s1181_s10 = inlined_call_operand.vmem [shape: f32[2,8,32], index: 10, kind: output, shape index: {}]  }
   0x1 LB: > { %s909_s14 = sadd.s32 4294967295, %s984_s13   ;;  %p913_p0 = scmp.ge.s32.totalorder %s984_s13, 1  ;;  %s984_s13 = sphi %s1049_s13, %s20_s13  }
   0x2   : > { %p320_p1 = scmp.lt.s32.totalorder %s984_s13, 3 }
   0x4   : > { %p321_p2 = pnand %p913_p0, %p320_p1 }
   0x5   : > { %p360_p3 = scmp.lt.s32.totalorder (!%p321_p2), %s909_s14, 1  ;;  %s986_s23 = smov (!%p321_p2), 96  }
   0x6   : > { %324 = sbr.rel (%p321_p2) target bundleno = 1620 (0x654), region = 60  ;;  %s987_s24 = smov (!%p321_p2), 120  }
   0x7   : > { %s988_s25 = smov (!%p321_p2), 112   ;;  %s989_s26 = smov (!%p321_p2), 104  }
   0x8   : > { %s990_s29 = smov (!%p321_p2), 72   ;;  %s991_s30 = smov (!%p321_p2), 80  }
   0x9   : > { %s992_s12 = smov (!%p321_p2), 88  }
   0xb   : > { %v377_v0 = vld [vmem:[%s1173_s2 + $0x18] sm:$0xff]  ;;  %v376_v2 = vld [vmem:[%s1173_s2 + $0x10] sm:$0xff]  ;;  %v375_v4 = vld [vmem:[%s1173_s2 + $0x8] sm:$0xff]  ;;  %s1183_s14 = smov (!%p360_p3, %s909_s14), 1  ;;  %vm390_vm0 = vcmask 261120   ;;  %vm441_vm1 = vcmask 64512  }
   0xc   : > { %v381_v1 = vld [vmem:[%s1175_s4 + $0x18] sm:$0xff]  ;;  %406 = vmatpush.msra.mxu0 %v377_v0  ;;  %v380_v3 = vld [vmem:[%s1175_s4 + $0x10] sm:$0xff]  ;;  %v379_v5 = vld [vmem:[%s1175_s4 + $0x8] sm:$0xff]  ;;  %s1081_s11 = sshll.u32 %s1183_s14, 3 }
   0xd   : > { %433 = vmatpush.msra.mxu1 %v381_v1  ;;  %v374_v6 = vld [vmem:[%s1173_s2] sm:$0xff]  ;;  %s363_s16 = scalar_lea.vmem %s1171_s0, %s1081_s11  ;;  %s367_s19 = scalar_lea.vmem %s1172_s1, %s1081_s11 }
   0xe   : > { %407 = vmatpush.msra.mxu0 %v376_v2  ;;  %v378_v7 = vld [vmem:[%s1175_s4] sm:$0xff]  ;;  %s371_s28 = scalar_lea.vmem %s1181_s10, %s1081_s11 }
   0xf   : > { %434 = vmatpush.msra.mxu1 %v380_v3  ;;  %v1087_v8 = vld [vmem:[%s363_s16] sm:$0xff] }
  0x10   : > { %408 = vmatpush.msra.mxu0 %v375_v4  ;;  %v373_v9 = vld [vmem:[%s367_s19] sm:$0xff] }
  0x11   : > { %435 = vmatpush.msra.mxu1 %v379_v5  ;;  %v953_v10 = vld [vmem:[%s1174_s3] ss:$0 sm:$0xff] }
  0x12   : > { %409 = vmatpush.msra.mxu0 %v374_v6  ;;  %v954_v11 = vld [vmem:[%s1176_s5] ss:$0 sm:$0xff] }
  0x13   : > { %436 = vmatpush.msra.mxu1 %v378_v7  ;;  %917 = vmatmul.msk.f32.vlgmr.msra.gmra.mxu0 %vm390_vm0, %v1087_v8  ;;  %v382_v26 = vld [vmem:[%s1177_s6] sm:$0xff] }
  0x14   : > { %918 = vmatmul.msk.f32.vlgmr.msra.gmra.mxu1 %vm390_vm0, %v373_v9 }
  0x15   : > { %613 = vmatpush.msrb.mxu1 %v382_v26  ;;  %v993_v26 = vmov 32.0  }
  0x90   : > { %v411_v12 = vpop.f32.mrf.mxu0 }
  0x91   : > { %v438_v13 = vpop.f32.mrf.mxu1  ;;  %v412_v14 = vadd.f32 %v953_v10, %v411_v12  ;;  %v385_v10 = vld [vmem:[%s1177_s6 + $0x18] sm:$0xff]  ;;  %v384_v12 = vld [vmem:[%s1177_s6 + $0x10] sm:$0xff] }
  0x92   : > { %v1102_v15 = vadd.f32 %v954_v11, %v438_v13  ;;  %v383_v11 = vld [vmem:[%s1177_s6 + $0x8] sm:$0xff] }
  0x93   : > { %506 = vrot.lane.b32.xlu2 %v412_v14, %s987_s24  ;;  %590 = vmatpush.msrb.mxu0 %v383_v11 }
  0x94   : > { %480 = vrot.lane.b32.xlu1 %v1102_v15, %s986_s23  ;;  %919 = vmatpush.xpose.msk.msra.mxu2 %vm441_vm1, %v1102_v15 }
  0x95   : > { %702 = vmatpush.msra.mxu0 %v384_v12 }
  0x97   : > { %920 = vmatmul.msk.f32.vlgmr.msra.gmra.mxu2 %vm441_vm1, %v412_v14 }
  0x9b   : > { %620 = vrot.lane.b32.xlu2 %v1102_v15, %s988_s25 }
  0x9c   : > { %508 = vrot.lane.b32.xlu1 %v1102_v15, %s987_s24 }
  0xa3   : > { %708 = vrot.lane.b32.xlu2 %v412_v14, %s989_s26 }
  0xa4   : > { %618 = vrot.lane.b32.xlu1 %v412_v14, %s988_s25 }
  0xed   : > { %v507_v27 = vpop.permute.xlu2 %506 }
  0xf5   : > { %v621_v31 = vpop.permute.xlu2 %620 }
  0xfd   : > { %v709_v35 = vpop.permute.xlu2 %708 }
 0x106   : > { %v481_v16 = vpop.permute.xlu1 %480 }
 0x107   : > { %501 = vmatpush.msra.mxu3 %v481_v16 }
 0x10e   : > { %v509_v17 = vpop.permute.xlu1 %508 }
 0x10f   : > { %922 = vmatpush.xpose.msk.msrb.mxu3 %vm441_vm1, %v509_v17 }
 0x116   : > { %v619_v33 = vpop.permute.xlu1 %618 }
 0x11a   : > { %v465_v18 = vpop.f32.mrf.mxu2 }
 0x11b   : > { %v468_v19 = vmul.f32 0.35355338, %v465_v18 }
 0x11d   : > { %v469_v20 = vsel %vm441_vm1, %v468_v19, -inf }
 0x11e   : > { %470 = vmax.xlane.f32.xlu0 %v469_v20  ;;  %v955_v20 = vld [vmem:[%s1178_s7] ss:$0 sm:$0xff] }
 0x191   : > { %v471_v21 = vpop.xlane.xlu0 %470 }
 0x192   : > { %v472_v22 = vsub.f32 %v468_v19, %v471_v21 }
 0x194   : > { %v473_v23 = vmul.f32 1.442695, %v472_v22 }
 0x196   : > { %958 = vpow2.f32 %v473_v23 }
 0x19c   : > { %v959_v24 = vpop.eup %958 }
 0x19d   : > { %v475_v25 = vsel %vm441_vm1, %v959_v24, 0.0 }
 0x19e   : > { %476 = vadd.xlane.f32.xlu0 %v475_v25 }
 0x1b2   : > { %710 = vrot.lane.b32.xlu0 %v1102_v15, %s989_s26 }
 0x211   : > { %v477_v28 = vpop.xlane.xlu0 %476 }
 0x212   : > { %960 = vrcp.f32 %v477_v28 }
 0x218   : > { %v961_v29 = vpop.eup %960 }
 0x219   : > { %v479_v30 = vmul.f32 %v961_v29, %v959_v24 }
 0x21b   : > { %921 = vmatmul.msk.f32.vlgmr.msra.gmra.mxu3 %vm441_vm1, %v479_v30 }
 0x21c   : > { %927 = vmatpush.xpose.msk.msra.mxu3 %vm441_vm1, %v621_v31 }
 0x223   : > { %923 = vmatmul.msk.f32.vlgmr.msrb.gmra.mxu3 %vm441_vm1, %v507_v27 }
 0x224   : > { %v711_v32 = vpop.permute.xlu0 %710 }
 0x225   : > { %931 = vmatpush.xpose.msk.msra.mxu1 %vm441_vm1, %v711_v32 }
 0x22b   : > { %928 = vmatmul.msk.f32.vlgmr.msra.gmra.mxu3 %vm441_vm1, %v619_v33 }
 0x29e   : > { %v503_v34 = vpop.f32.mrf.mxu3 }
 0x29f   : > { %926 = vmatmul.msk.f32.vlgmr.msrb.gmra.mxu1 %vm441_vm1, %v503_v34 }
 0x2a6   : > { %v531_v36 = vpop.f32.mrf.mxu3 }
 0x2a7   : > { %v534_v37 = vmul.f32 0.35355338, %v531_v36  ;;  %932 = vmatmul.msk.f32.vlgmr.msra.gmra.mxu1 %vm441_vm1, %v709_v35 }
 0x2a9   : > { %v535_v38 = vsel %vm441_vm1, %v534_v37, -inf }
 0x2aa   : > { %536 = vmax.xlane.f32.xlu1 %v535_v38 }
 0x2ae   : > { %v643_v39 = vpop.f32.mrf.mxu3 }
 0x2af   : > { %v646_v40 = vmul.f32 0.35355338, %v643_v39 }
 0x2b1   : > { %v647_v41 = vsel %vm441_vm1, %v646_v40, -inf }
 0x2b2   : > { %648 = vmax.xlane.f32.xlu0 %v647_v41 }
 0x2c6   : > { %748 = vrot.lane.b32.xlu0 %v1102_v15, %s990_s29 }
 0x31c   : > { %v1127_v42 = vpop.f32.mrf.mxu1 }
 0x31d   : > { %v537_v43 = vpop.xlane.xlu1 %536 }
 0x31e   : > { %v538_v44 = vsub.f32 %v534_v37, %v537_v43 }
 0x320   : > { %v539_v45 = vmul.f32 1.442695, %v538_v44 }
 0x322   : > { %962 = vpow2.f32 %v539_v45 }
 0x324   : > { %v733_v46 = vpop.f32.mrf.mxu1 }
 0x325   : > { %v736_v47 = vmul.f32 0.35355338, %v733_v46  ;;  %v649_v48 = vpop.xlane.xlu0 %648  ;;  %v956_v46 = vld [vmem:[%s1179_s8] ss:$0 sm:$0xff] }
 0x326   : > { %v650_v49 = vsub.f32 %v646_v40, %v649_v48  ;;  %v957_v48 = vld [vmem:[%s1180_s9] ss:$0 sm:$0xff] }
 0x327   : > { %v737_v50 = vsel %vm441_vm1, %v736_v47, -inf }
 0x328   : > { %738 = vmax.xlane.f32.xlu2 %v737_v50  ;;  %v651_v51 = vmul.f32 1.442695, %v650_v49  ;;  %v963_v52 = vpop.eup %962 }
 0x329   : > { %v541_v53 = vsel %vm441_vm1, %v963_v52, 0.0 }
 0x32a   : > { %964 = vpow2.f32 %v651_v51 }
 0x330   : > { %542 = vadd.xlane.f32.xlu2 %v541_v53  ;;  %v965_v54 = vpop.eup %964 }
 0x331   : > { %v653_v55 = vsel %vm441_vm1, %v965_v54, 0.0 }
 0x338   : > { %654 = vadd.xlane.f32.xlu2 %v653_v55  ;;  %v749_v56 = vpop.permute.xlu0 %748 }
 0x339   : > { %769 = vmatpush.msrb.mxu3 %v749_v56 }
 0x350   : > { %658 = vrot.lane.b32.xlu2 %v1102_v15, %s991_s30 }
 0x39b   : > { %v739_v57 = vpop.xlane.xlu2 %738 }
 0x39c   : > { %v740_v58 = vsub.f32 %v736_v47, %v739_v57 }
 0x39e   : > { %v741_v59 = vmul.f32 1.442695, %v740_v58 }
 0x3a0   : > { %966 = vpow2.f32 %v741_v59 }
 0x3a3   : > { %v543_v63 = vpop.xlane.xlu2 %542 }
 0x3a6   : > { %v967_v60 = vpop.eup %966 }
 0x3a7   : > { %v743_v61 = vsel %vm441_vm1, %v967_v60, 0.0 }
 0x3a8   : > { %744 = vadd.xlane.f32.xlu1 %v743_v61 }
 0x3ab   : > { %v655_v2 = vpop.xlane.xlu2 %654 }
 0x3b3   : > { %v659_v6 = vpop.permute.xlu2 %658 }
 0x3c1   : > { %546 = vrot.lane.b32.xlu1 %v1102_v15, %s992_s12 }
 0x41b   : > { %v745_v62 = vpop.xlane.xlu1 %744 }
 0x41c   : > { %968 = vrcp.f32 %v745_v62 }
 0x41d   : > { %970 = vrcp.f32 %v543_v63 }
 0x41e   : > { %972 = vrcp.f32 %v655_v2 }
 0x41f   : > { %974 = vrcp.f32 %v993_v26 }
 0x422   : > { %v969_v0 = vpop.eup %968 }
 0x423   : > { %v747_v1 = vmul.f32 %v969_v0, %v967_v60  ;;  %v971_v3 = vpop.eup %970 }
 0x424   : > { %v545_v5 = vmul.f32 %v971_v3, %v963_v52  ;;  %v973_v7 = vpop.eup %972 }
 0x425   : > { %933 = vmatmul.msk.f32.vlgmr.msrb.gmra.mxu3 %vm441_vm1, %v747_v1  ;;  %v657_v9 = vmul.f32 %v973_v7, %v965_v54  ;;  %v975_v27 = vpop.eup %974 }
 0x426   : > { %v810_v28 = vmul.f32 32.0, %v975_v27  ;;  %vm814_vm2 = vweird.f32 %v975_v27 }
 0x428   : > { %v811_v29 = vsub.f32 1.0, %v810_v28 }
 0x42a   : > { %v812_v30 = vmul.f32 %v975_v27, %v811_v29 }
 0x42c   : > { %v813_v31 = vadd.f32 %v975_v27, %v812_v30 }
 0x42e   : > { %v815_v32 = vsel %vm814_vm2, %v975_v27, %v813_v31 }
 0x433   : > { %v547_v4 = vpop.permute.xlu1 %546 }
 0x434   : > { %567 = vmatpush.msrb.mxu2 %v547_v4 }
 0x435   : > { %924 = vmatmul.msk.f32.vlgmr.msrb.gmra.mxu2 %vm441_vm1, %v545_v5 }
 0x436   : > { %679 = vmatpush.msra.mxu2 %v659_v6 }
 0x438   : > { %792 = vmatpush.msrb.mxu2 %v385_v10 }
 0x43d   : > { %929 = vmatmul.msk.f32.vlgmr.msra.gmra.mxu2 %vm441_vm1, %v657_v9 }
 0x4a8   : > { %v771_v13 = vpop.f32.mrf.mxu3 }
 0x4a9   : > { %934 = vmatmul.msk.f32.vlgmr.msrb.gmra.mxu2 %vm441_vm1, %v771_v13 }
 0x4b8   : > { %v569_v14 = vpop.f32.mrf.mxu2 }
 0x4b9   : > { %925 = vmatmul.msk.f32.vlgmr.msrb.gmra.mxu0 %vm441_vm1, %v569_v14 }
 0x4c0   : > { %v681_v15 = vpop.f32.mrf.mxu2 }
 0x4c1   : > { %930 = vmatmul.msk.f32.vlgmr.msra.gmra.mxu0 %vm441_vm1, %v681_v15 }
 0x52c   : > { %v794_v21 = vpop.f32.mrf.mxu2 }
 0x536   : > { %v592_v16 = vpop.f32.mrf.mxu0 }
 0x537   : > { %v616_v17 = vadd.f32 %v1127_v42, %v592_v16 }
 0x53e   : > { %v704_v18 = vpop.f32.mrf.mxu0 }
 0x53f   : > { %v707_v19 = vadd.f32 %v704_v18, %v616_v17 }
 0x541   : > { %v797_v22 = vadd.f32 %v794_v21, %v707_v19 }
 0x543   : > { %v802_v23 = vadd.f32 %v955_v20, %v797_v22 }
 0x545   : > { %v803_v24 = vadd.f32 %v802_v23, %v1087_v8 }
 0x547   : > { %v806_v25 = vsel %vm390_vm0, %v803_v24, 0.0 }
 0x548   : > { %807 = vadd.xlane.f32.xlu0 %v806_v25 }
 0x5bb   : > { %v808_v33 = vpop.xlane.xlu0 %807 }
 0x5bc   : > { %v816_v34 = vmul.f32 %v815_v32, %v808_v33 }
 0x5be   : > { %v817_v35 = vsub.f32 %v803_v24, %v816_v34 }
 0x5c0   : > { %v818_v36 = vmul.f32 %v817_v35, %v817_v35 }
 0x5c2   : > { %v819_v37 = vsel %vm390_vm0, %v818_v36, 0.0 }
 0x5c3   : > { %820 = vadd.xlane.f32.xlu1 %v819_v37 }
 0x636   : > { %v821_v8 = vpop.xlane.xlu1 %820 }
 0x637   : > { %v822_v38 = vmul.f32 %v821_v8, %v815_v32 }
 0x639   : > { %v823_v39 = vadd.f32 1e-05, %v822_v38 }
 0x63b   : > { %976 = vrsqrt.f32 %v823_v39  ;;  %vm830_vm4 = vweird.f32 %v823_v39 }
 0x641   : > { %v977_v40 = vpop.eup %976 }
 0x642   : > { %v825_v41 = vmul.f32 %v977_v40, %v823_v39  ;;  %vm831_vm3 = vweird.f32 %v977_v40 }
 0x643   : > { %vm832_vm5 = vmor %vm830_vm4, %vm831_vm3 }
 0x644   : > { %v826_v42 = vmul.f32 %v977_v40, %v825_v41 }
 0x646   : > { %v827_v43 = vmul.f32 0.5, %v826_v42 }
 0x648   : > { %v828_v44 = vsub.f32 1.5, %v827_v43 }
 0x64a   : > { %v829_v45 = vmul.f32 %v977_v40, %v828_v44 }
 0x64c   : > { %v833_v47 = vsel %vm832_vm5, %v977_v40, %v829_v45 }
 0x64d   : > { %v834_v49 = vmul.f32 %v833_v47, %v817_v35 }
 0x64f   : > { %v838_v50 = vmul.f32 %v956_v46, %v834_v49 }
 0x651   : > { %v842_v51 = vadd.f32 %v957_v48, %v838_v50 }
 0x653   : > { %843 = vst.msk [vmem:[%s371_s28] sm:$0xff] %vm390_vm0, %v842_v51 }
 0x654 PF: > { %s20_s13 = sadd.s32 1, %s984_s13  }
 0x655   : > { %p17_p4 = scmp.ge.s32.totalorder %s20_s13, 4  }
 0x657   :  { %19 = sbr.rel (!%p17_p4) target bundleno = 1 (0x1), region = 93 }

</bundles_post_ra>
